<compile_context>
chip_gen: v7x
topology: tpu7x:2x2x1
jax: 0.10.0
libtpu: 0.0.40
codegen_flags: <defaults>
</compile_context>

<pallas_src>
import jax
import jax.numpy as jnp
from jax.experimental import pallas as pl
from jax.experimental.pallas import tpu as pltpu


_LANE = 128
_NEG = -1e30  # finite "-inf" for padded logit columns


def _round_up(x, m):
    return ((x + m - 1) // m) * m


def mlp_kernel(x_ref,
               w1_ref, b1_ref,
               w2_ref, b2_ref,
               w3_ref, b3_ref,
               w4_ref, b4_ref,
               out_ref):
    """Whole forward pass for one batch tile: 4 matmuls + tanh + log_softmax."""
    cdt = w1_ref.dtype  # compute dtype for MXU inputs (bf16 or f32)

    x = x_ref[...]  # already in compute dtype
    h = jnp.tanh(jnp.dot(x, w1_ref[...],
                         preferred_element_type=jnp.float32) + b1_ref[...])
    h = jnp.tanh(jnp.dot(h.astype(cdt), w2_ref[...],
                         preferred_element_type=jnp.float32) + b2_ref[...])
    h = jnp.tanh(jnp.dot(h.astype(cdt), w3_ref[...],
                         preferred_element_type=jnp.float32) + b3_ref[...])
    logits = jnp.dot(h.astype(cdt), w4_ref[...],
                     preferred_element_type=jnp.float32) + b4_ref[...]

    # Numerically stable log_softmax along the feature axis.  Padded columns
    # carry ~-1e30 logits so they contribute 0 to the sum and never win the max.
    m = jnp.max(logits, axis=-1, keepdims=True)
    shifted = logits - m
    lse = jnp.log(jnp.sum(jnp.exp(shifted), axis=-1, keepdims=True))
    out_ref[...] = (shifted - lse).astype(out_ref.dtype)


def nn_forward(x, params, *, bm=256, compute_dtype=jnp.bfloat16):
    """params = (w1, b1, w2, b2, w3, b3, w4, b4); weights stored as (in, out)."""
    w1, b1, w2, b2, w3, b3, w4, b4 = params
    B, D_in = x.shape
    D_out = w4.shape[-1]
    D_out_p = _round_up(max(D_out, _LANE), _LANE)     # lane-dense output slab

    # Batch tile: multiple of 8, no bigger than the (8-rounded) batch.
    bm = max(8, min(_round_up(bm, 8), _round_up(B, 8)))
    B_p = _round_up(B, bm)

    # Cast + pad activations along batch.
    x_p = x.astype(compute_dtype)
    if B_p != B:
        x_p = jnp.pad(x_p, ((0, B_p - B), (0, 0)))

    # Pad final layer to a lane-dense width; padded columns get -1e30 bias so
    # log_softmax over the real columns is unchanged.
    pad_n = D_out_p - D_out
    w4_p = jnp.pad(w4, ((0, 0), (0, pad_n))) if pad_n else w4
    b4_p = jnp.pad(b4, ((0, 0), (0, pad_n)), constant_values=_NEG) if pad_n else b4

    tensors = (
        x_p,
        w1.astype(compute_dtype), b1.astype(jnp.float32),
        w2.astype(compute_dtype), b2.astype(jnp.float32),
        w3.astype(compute_dtype), b3.astype(jnp.float32),
        w4_p.astype(compute_dtype), b4_p.astype(jnp.float32),
    )

    # x streams by batch tile; params use constant index_maps -> VMEM-resident.
    in_specs = [pl.BlockSpec((bm, D_in), lambda i: (i, 0))]
    for t in tensors[1:]:
        # NOTE: bind ndim now (default arg) to avoid the late-binding closure bug.
        in_specs.append(pl.BlockSpec(t.shape, lambda i, nd=t.ndim: (0,) * nd))

    out_specs = pl.BlockSpec((bm, D_out_p), lambda i: (i, 0))

    flops = 2 * B_p * (D_in * 256 + 256 * 128 + 128 * 64 + 64 * D_out_p)
    transcendentals = B_p * (256 + 128 + 64 + D_out_p)      # tanh + exp
    bytes_accessed = (sum(int(t.size) * t.dtype.itemsize for t in tensors)
                      + B_p * D_out_p * 4)

    out_p = pl.pallas_call(
        mlp_kernel,
        out_shape=jax.ShapeDtypeStruct((B_p, D_out_p), jnp.float32),
        grid_spec=pltpu.PrefetchScalarGridSpec(
            num_scalar_prefetch=0,
            grid=(B_p // bm,),
            in_specs=in_specs,
            out_specs=out_specs,
        ),
        compiler_params=pltpu.CompilerParams(
            dimension_semantics=("parallel",)),
        cost_estimate=pl.CostEstimate(
            flops=flops,
            transcendentals=transcendentals,
            bytes_accessed=bytes_accessed),
    )(*tensors)

    # Drop padded batch rows and padded logit columns.
    return out_p[:B, :D_out]


def init_params(key, input_size, output_size):
    """Deterministic parameter init; weights stored as (in, out)."""
    dims = [input_size, 256, 128, 64, output_size]
    params = []
    for i in range(4):
        key, kw, kb = jax.random.split(key, 3)
        fan_in = dims[i]
        bound = 1.0 / jnp.sqrt(fan_in)  # PyTorch nn.Linear default range
        w = jax.random.uniform(kw, (dims[i], dims[i + 1]),
                               minval=-bound, maxval=bound, dtype=jnp.float32)
        b = jax.random.uniform(kb, (1, dims[i + 1]),
                               minval=-bound, maxval=bound, dtype=jnp.float32)
        params += [w, b]
    return tuple(params)


def nn_forward_ref(x, params):
    """Plain-JAX f32 reference for correctness checking."""
    w1, b1, w2, b2, w3, b3, w4, b4 = params
    h = jnp.tanh(x @ w1 + b1)
    h = jnp.tanh(h @ w2 + b2)
    h = jnp.tanh(h @ w3 + b3)
    logits = h @ w4 + b4
    return jax.nn.log_softmax(logits, axis=1)


if __name__ == "__main__":
    key = jax.random.PRNGKey(0)
    batch, input_size, output_size = 8, 8, 2   # small Titanic-like shapes

    kx, kp = jax.random.split(key)
    x = jax.random.normal(kx, (batch, input_size), dtype=jnp.float32)
    params = init_params(kp, input_size, output_size)
    ref = nn_forward_ref(x, params)

    # 1) f32 compute path: exact match vs reference.
    out_f32 = jax.block_until_ready(
        nn_forward(x, params, bm=128, compute_dtype=jnp.float32))
    assert out_f32.shape == (batch, output_size)
    assert jnp.allclose(out_f32, ref, atol=1e-5, rtol=1e-5), "f32 mismatch"

    # 2) bf16 matmul-input path (f32 accumulation / tanh): loose tolerance.
    out_bf16 = jax.block_until_ready(
        nn_forward(x, params, bm=128, compute_dtype=jnp.bfloat16))
    assert out_bf16.shape == (batch, output_size)
    assert jnp.allclose(out_bf16, ref, atol=5e-2), "bf16 mismatch"

    # 3) Ragged batch: exercises batch padding + multi-step grid.
    x2 = jax.random.normal(jax.random.PRNGKey(1), (20, input_size),
                           dtype=jnp.float32)
    ref2 = nn_forward_ref(x2, params)
    out2 = jax.block_until_ready(
        nn_forward(x2, params, bm=16, compute_dtype=jnp.float32))
    assert out2.shape == (20, output_size)
    assert jnp.allclose(out2, ref2, atol=1e-5, rtol=1e-5), "padded-batch mismatch"

    print("KERNEL_OK")
</pallas_src>

<mosaic_0001>
module attributes {stable_mosaic.version = 11 : i64} {
  func.func @mlp_kernel(%arg0: i32, %arg1: memref<8x8xf32, #tpu.memory_space<vmem>>, %arg2: memref<8x256xf32, #tpu.memory_space<vmem>>, %arg3: memref<1x256xf32, #tpu.memory_space<vmem>>, %arg4: memref<256x128xf32, #tpu.memory_space<vmem>>, %arg5: memref<1x128xf32, #tpu.memory_space<vmem>>, %arg6: memref<128x64xf32, #tpu.memory_space<vmem>>, %arg7: memref<1x64xf32, #tpu.memory_space<vmem>>, %arg8: memref<64x128xf32, #tpu.memory_space<vmem>>, %arg9: memref<1x128xf32, #tpu.memory_space<vmem>>, %arg10: memref<8x128xf32, #tpu.memory_space<vmem>>) attributes {dimension_semantics = [#tpu.dimension_semantics<parallel>], iteration_bounds = array<i64: 1>, scalar_prefetch = 0 : i64, scratch_operands = 0 : i64, tpu.core_type = #tpu.core_type<tc>, window_params = [{transform_indices = @transform_0, window_bounds = array<i64: 8, 8>}, {pipeline_mode = #tpu.pipeline_mode<synchronous>, transform_indices = @transform_1, window_bounds = array<i64: 8, 256>}, {pipeline_mode = #tpu.pipeline_mode<synchronous>, transform_indices = @transform_2, window_bounds = array<i64: 1, 256>}, {pipeline_mode = #tpu.pipeline_mode<synchronous>, transform_indices = @transform_3, window_bounds = array<i64: 256, 128>}, {pipeline_mode = #tpu.pipeline_mode<synchronous>, transform_indices = @transform_4, window_bounds = array<i64: 1, 128>}, {pipeline_mode = #tpu.pipeline_mode<synchronous>, transform_indices = @transform_5, window_bounds = array<i64: 128, 64>}, {pipeline_mode = #tpu.pipeline_mode<synchronous>, transform_indices = @transform_6, window_bounds = array<i64: 1, 64>}, {pipeline_mode = #tpu.pipeline_mode<synchronous>, transform_indices = @transform_7, window_bounds = array<i64: 64, 128>}, {pipeline_mode = #tpu.pipeline_mode<synchronous>, transform_indices = @transform_8, window_bounds = array<i64: 1, 128>}, {transform_indices = @transform_9, window_bounds = array<i64: 8, 128>}]} {
    %c0 = arith.constant 0 : index
    %c0_0 = arith.constant 0 : index
    %0 = vector.load %arg1[%c0, %c0_0] : memref<8x8xf32, #tpu.memory_space<vmem>>, vector<8x8xf32>
    %c0_1 = arith.constant 0 : index
    %c0_2 = arith.constant 0 : index
    %1 = vector.load %arg2[%c0_1, %c0_2] : memref<8x256xf32, #tpu.memory_space<vmem>>, vector<8x256xf32>
    %cst = arith.constant dense<0.000000e+00> : vector<8x256xf32>
    %2 = tpu.matmul %0, %1, %cst {dimension_numbers = #tpu.dot_dimension_numbers<[1], [0], [0], [1], [0, 0, 1, 1], [], []>} : vector<8x8xf32>, vector<8x256xf32>, vector<8x256xf32> -> vector<8x256xf32>
    %c0_3 = arith.constant 0 : index
    %c0_4 = arith.constant 0 : index
    %3 = vector.load %arg3[%c0_3, %c0_4] : memref<1x256xf32, #tpu.memory_space<vmem>>, vector<1x256xf32>
    %4 = vector.broadcast %3 : vector<1x256xf32> to vector<8x256xf32>
    %5 = arith.addf %2, %4 : vector<8x256xf32>
    %6 = math.tanh %5 : vector<8x256xf32>
    %c0_5 = arith.constant 0 : index
    %c0_6 = arith.constant 0 : index
    %7 = vector.load %arg4[%c0_5, %c0_6] : memref<256x128xf32, #tpu.memory_space<vmem>>, vector<256x128xf32>
    %cst_7 = arith.constant dense<0.000000e+00> : vector<8x128xf32>
    %8 = tpu.matmul %6, %7, %cst_7 {dimension_numbers = #tpu.dot_dimension_numbers<[1], [0], [0], [1], [0, 0, 1, 1], [], []>} : vector<8x256xf32>, vector<256x128xf32>, vector<8x128xf32> -> vector<8x128xf32>
    %c0_8 = arith.constant 0 : index
    %c0_9 = arith.constant 0 : index
    %9 = vector.load %arg5[%c0_8, %c0_9] : memref<1x128xf32, #tpu.memory_space<vmem>>, vector<1x128xf32>
    %10 = vector.broadcast %9 : vector<1x128xf32> to vector<8x128xf32>
    %11 = arith.addf %8, %10 : vector<8x128xf32>
    %12 = math.tanh %11 : vector<8x128xf32>
    %c0_10 = arith.constant 0 : index
    %c0_11 = arith.constant 0 : index
    %13 = vector.load %arg6[%c0_10, %c0_11] : memref<128x64xf32, #tpu.memory_space<vmem>>, vector<128x64xf32>
    %cst_12 = arith.constant dense<0.000000e+00> : vector<8x64xf32>
    %14 = tpu.matmul %12, %13, %cst_12 {dimension_numbers = #tpu.dot_dimension_numbers<[1], [0], [0], [1], [0, 0, 1, 1], [], []>} : vector<8x128xf32>, vector<128x64xf32>, vector<8x64xf32> -> vector<8x64xf32>
    %c0_13 = arith.constant 0 : index
    %c0_14 = arith.constant 0 : index
    %15 = vector.load %arg7[%c0_13, %c0_14] : memref<1x64xf32, #tpu.memory_space<vmem>>, vector<1x64xf32>
    %16 = vector.broadcast %15 : vector<1x64xf32> to vector<8x64xf32>
    %17 = arith.addf %14, %16 : vector<8x64xf32>
    %18 = math.tanh %17 : vector<8x64xf32>
    %c0_15 = arith.constant 0 : index
    %c0_16 = arith.constant 0 : index
    %19 = vector.load %arg8[%c0_15, %c0_16] : memref<64x128xf32, #tpu.memory_space<vmem>>, vector<64x128xf32>
    %cst_17 = arith.constant dense<0.000000e+00> : vector<8x128xf32>
    %20 = tpu.matmul %18, %19, %cst_17 {dimension_numbers = #tpu.dot_dimension_numbers<[1], [0], [0], [1], [0, 0, 1, 1], [], []>} : vector<8x64xf32>, vector<64x128xf32>, vector<8x128xf32> -> vector<8x128xf32>
    %c0_18 = arith.constant 0 : index
    %c0_19 = arith.constant 0 : index
    %21 = vector.load %arg9[%c0_18, %c0_19] : memref<1x128xf32, #tpu.memory_space<vmem>>, vector<1x128xf32>
    %22 = vector.broadcast %21 : vector<1x128xf32> to vector<8x128xf32>
    %23 = arith.addf %20, %22 : vector<8x128xf32>
    %cst_20 = arith.constant dense<0xFF800000> : vector<8xf32>
    %24 = vector.multi_reduction <maximumf>, %23, %cst_20 [1] : vector<8x128xf32> to vector<8xf32>
    %25 = vector.shape_cast %24 : vector<8xf32> to vector<8x1xf32>
    %26 = vector.broadcast %25 : vector<8x1xf32> to vector<8x128xf32>
    %27 = arith.subf %23, %26 : vector<8x128xf32>
    %28 = math.exp %27 : vector<8x128xf32>
    %cst_21 = arith.constant dense<0.000000e+00> : vector<8xf32>
    %29 = vector.multi_reduction <add>, %28, %cst_21 [1] : vector<8x128xf32> to vector<8xf32>
    %30 = vector.shape_cast %29 : vector<8xf32> to vector<8x1xf32>
    %31 = math.log %30 : vector<8x1xf32>
    %32 = vector.broadcast %31 : vector<8x1xf32> to vector<8x128xf32>
    %33 = arith.subf %27, %32 : vector<8x128xf32>
    %c0_22 = arith.constant 0 : index
    %c0_23 = arith.constant 0 : index
    %34 = vector.load %arg10[%c0_22, %c0_23] : memref<8x128xf32, #tpu.memory_space<vmem>>, vector<8x128xf32>
    tpu.vector_store %arg10[%c0_22, %c0_23], %33 {strides = array<i32>} : memref<8x128xf32, #tpu.memory_space<vmem>>, vector<8x128xf32>,
    return
  }
  func.func @transform_0(%arg0: i32) -> (i32, i32) {
    %c0_i32 = arith.constant 0 : i32
    %c0_i32_0 = arith.constant 0 : i32
    return %arg0, %c0_i32 : i32, i32
  }
  func.func @transform_1(%arg0: i32) -> (i32, i32) {
    %c0_i32 = arith.constant 0 : i32
    %c0_i32_0 = arith.constant 0 : i32
    %c0_i32_1 = arith.constant 0 : i32
    return %c0_i32, %c0_i32_0 : i32, i32
  }
  func.func @transform_2(%arg0: i32) -> (i32, i32) {
    %c0_i32 = arith.constant 0 : i32
    %c0_i32_0 = arith.constant 0 : i32
    %c0_i32_1 = arith.constant 0 : i32
    return %c0_i32, %c0_i32_0 : i32, i32
  }
  func.func @transform_3(%arg0: i32) -> (i32, i32) {
    %c0_i32 = arith.constant 0 : i32
    %c0_i32_0 = arith.constant 0 : i32
    %c0_i32_1 = arith.constant 0 : i32
    return %c0_i32, %c0_i32_0 : i32, i32
  }
  func.func @transform_4(%arg0: i32) -> (i32, i32) {
    %c0_i32 = arith.constant 0 : i32
    %c0_i32_0 = arith.constant 0 : i32
    %c0_i32_1 = arith.constant 0 : i32
    return %c0_i32, %c0_i32_0 : i32, i32
  }
  func.func @transform_5(%arg0: i32) -> (i32, i32) {
    %c0_i32 = arith.constant 0 : i32
    %c0_i32_0 = arith.constant 0 : i32
    %c0_i32_1 = arith.constant 0 : i32
    return %c0_i32, %c0_i32_0 : i32, i32
  }
  func.func @transform_6(%arg0: i32) -> (i32, i32) {
    %c0_i32 = arith.constant 0 : i32
    %c0_i32_0 = arith.constant 0 : i32
    %c0_i32_1 = arith.constant 0 : i32
    return %c0_i32, %c0_i32_0 : i32, i32
  }
  func.func @transform_7(%arg0: i32) -> (i32, i32) {
    %c0_i32 = arith.constant 0 : i32
    %c0_i32_0 = arith.constant 0 : i32
    %c0_i32_1 = arith.constant 0 : i32
    return %c0_i32, %c0_i32_0 : i32, i32
  }
  func.func @transform_8(%arg0: i32) -> (i32, i32) {
    %c0_i32 = arith.constant 0 : i32
    %c0_i32_0 = arith.constant 0 : i32
    %c0_i32_1 = arith.constant 0 : i32
    return %c0_i32, %c0_i32_0 : i32, i32
  }
  func.func @transform_9(%arg0: i32) -> (i32, i32) {
    %c0_i32 = arith.constant 0 : i32
    %c0_i32_0 = arith.constant 0 : i32
    return %arg0, %c0_i32 : i32, i32
  }
}

</mosaic_0001>

<bundles_post_ra>
// kernel: tpu_custom_call.1
= control target key start
LH: loop header
LB: loop body
LE: loop exit
PB: predicated region body
PF: predicated region fallthrough
CT: control target
= control target key end

     0   :  { %14 = vsyncpa [#allocation3], 0  ;;  %s902_s0 = inlined_call_operand.vmem [shape: f32[8,8], index: 0, kind: input, shape index: {}]   ;;  %s903_s1 = inlined_call_operand.vmem [shape: f32[8,256], index: 1, kind: input, shape index: {}]   ;;  %s904_s2 = inlined_call_operand.vmem [shape: f32[1,256], index: 2, kind: input, shape index: {}]   ;;  %s905_s3 = inlined_call_operand.hbm [shape: f32[256,128], index: 3, kind: input, shape index: {}]   ;;  %s906_s4 = inlined_call_operand.vmem [shape: f32[1,128], index: 4, kind: input, shape index: {}]   ;;  %s907_s5 = inlined_call_operand.vmem [shape: f32[128,64], index: 5, kind: input, shape index: {}]   ;;  %s908_s6 = inlined_call_operand.vmem [shape: f32[1,64], index: 6, kind: input, shape index: {}]   ;;  %s909_s7 = inlined_call_operand.vmem [shape: f32[64,128], index: 7, kind: input, shape index: {}]   ;;  %s910_s8 = inlined_call_operand.vmem [shape: f32[1,128], index: 8, kind: input, shape index: {}]   ;;  %s911_s9 = inlined_call_operand.hbm [shape: f32[8,128], index: 9, kind: output, shape index: {}]  }
   0x1   :  { %15 = vsyncpa [#allocation4], 0  ;;  %s713_s30 = smov [#allocation2]   ;;  %s665_s13 = scalar_lea.hbm %s905_s3, 4096 }
   0x2   :  { %s27_s10 = sshll.u32 %s713_s30, 4  ;;  %p666_p0 = scmp.ne.s32.totalorder %s905_s3, %s665_s13  ;;  %s28_s10 = int_to_ptr.vmem [resolvable:$true] %s27_s10 }
   0x3   :  { %p669_p1 = scmp.lt.u32.totalorder %s665_s13, %s905_s3 }
   0x5   :  { %p671_p2 = pnand %p669_p1, %p666_p0 }
   0x7   :  { %674 = shalt.err (!%p671_p2)
}
   0x8   :  { %s675_s18 = scalar_lea.vmem %s28_s10, 4096  ;;  %p680_p4 = scmp.lt.s32.totalorder %s28_s10, %s28_s10 }
   0x9   :  { %p676_p3 = scmp.ne.s32.totalorder %s28_s10, %s675_s18  ;;  %p681_p5 = scmp.lt.s32.totalorder %s675_s18, %s675_s18 }
   0xb   :  { %p682_p6 = por %p681_p5, %p680_p4 }
   0xd   :  { %p683_p7 = pnand %p682_p6, %p676_p3 }
   0xf   :  { %686 = shalt.err (!%p683_p7)
}
  0x10   :  { %s714_s19 = smov 128   ;;  %s715_s20 = smov 8  }
  0x11   :  { %33 = dma.hbm_to_vmem [thread:$0]  %s905_s3, 4096, %s28_s10, [#allocation3], %s714_s19, %s714_s19, %s715_s20  }
  0x12   :  { %709 = dma.done.wait [#allocation3], 4096  }
  0x13   :  { %710 = vsyncadd [#allocation3], 4294963200  ;;  %v716_v0 = vmov 0.0   ;;  %v49_v1 = vld [vmem:[%s903_s1 + $0x8] sm:$0xff]  ;;  %v48_v2 = vld [vmem:[%s903_s1] sm:$0xff]  ;;  %vm62_vm0 = vcmask 64512  }
  0x14   :  { %130 = vmatprep.mubr.f32.mxu0 %v716_v0  ;;  %v47_v3 = vld [vmem:[%s902_s0] sm:$0xff]  ;;  %66 = vmatprep.subr.mxu0 %v49_v1  ;;  %v156_v5 = vld [vmem:[#allocation2 + $0x88] sm:$0xff]  ;;  %v157_v9 = vld [vmem:[#allocation2 + $0x90] sm:$0xff]  ;;  %v717_v55 = vmov 0.0|0.0   ;;  %vm718_vm1 = vmmov 0   ;;  %vm358_vm2 = vcmask 523264  }
  0x15   :  { %v155_v4 = vld [vmem:[#allocation2 + $0x80] sm:$0xff]  ;;  %67 = vmatpush1.msra.mxu0 %v48_v2  ;;  %v140_v8 = vld [vmem:[#allocation2 + $0x8] sm:$0xff]  ;;  %v158_v10 = vld [vmem:[#allocation2 + $0x98] sm:$0xff]  ;;  %v52_v2 = vlaneseq }
  0x16   :  { %v139_v6 = vld [vmem:[#allocation2] sm:$0xff]  ;;  %v578_v7 = vpack.c.bf16 %v156_v5, %v155_v4  ;;  %458 = vmatmul.mubr.msk.f32.vlgmr.msra.gmra.mrb[0].mxu0 %vm62_vm0, %v47_v3  ;;  %v582_v12 = vpack.c.bf16 %v158_v10, %v157_v9  ;;  %v141_v13 = vld [vmem:[#allocation2 + $0x10] sm:$0xff]  ;;  %v142_v14 = vld [vmem:[#allocation2 + $0x18] sm:$0xff]  ;;  %610 = vmatprep.subr.bf16.mxu0 %v717_v55 }
  0x17   :  { %v580_v11 = vpack.c.bf16 %v140_v8, %v139_v6  ;;  %v159_v15 = vld [vmem:[#allocation2 + $0xa0] sm:$0xff]  ;;  %v160_v16 = vld [vmem:[#allocation2 + $0xa8] sm:$0xff]  ;;  %v584_v17 = vpack.c.bf16 %v142_v14, %v141_v13  ;;  %v161_v21 = vld [vmem:[#allocation2 + $0xb0] sm:$0xff]  ;;  %v53_v3 = vshrl.u32 %v52_v2, 7  ;;  %556 = vmatprep.mubr.msk.f32.mxu0 %vm718_vm1, %v716_v0 }
  0x18   :  { %579 = vmatprep.subr.bf16.mxu1 %v578_v7  ;;  %v586_v18 = vpack.c.bf16 %v160_v16, %v159_v15  ;;  %v143_v19 = vld [vmem:[#allocation2 + $0x20] sm:$0xff]  ;;  %v144_v20 = vld [vmem:[#allocation2 + $0x28] sm:$0xff]  ;;  %v162_v22 = vld [vmem:[#allocation2 + $0xb8] sm:$0xff] }
  0x19   :  { %581 = vmatpush3.bf16.msra.mxu1 %v580_v11  ;;  %v588_v23 = vpack.c.bf16 %v144_v20, %v143_v19  ;;  %v590_v24 = vpack.c.bf16 %v162_v22, %v161_v21  ;;  %v145_v25 = vld [vmem:[#allocation2 + $0x30] sm:$0xff]  ;;  %v146_v26 = vld [vmem:[#allocation2 + $0x38] sm:$0xff]  ;;  %v163_v28 = vld [vmem:[#allocation2 + $0xc0] sm:$0xff]  ;;  %v54_v4 = vsub.s32 0, %v53_v3  ;;  %v58_v6 = vsub.s32 1, %v53_v3 }
  0x1a   :  { %583 = vmatprep.subr.bf16.mxu1 %v582_v12  ;;  %v592_v27 = vpack.c.bf16 %v146_v26, %v145_v25  ;;  %v164_v29 = vld [vmem:[#allocation2 + $0xc8] sm:$0xff]  ;;  %v147_v31 = vld [vmem:[#allocation2 + $0x40] sm:$0xff]  ;;  %v165_v34 = vld [vmem:[#allocation2 + $0xd0] sm:$0xff] }
  0x1b   :  { %v594_v30 = vpack.c.bf16 %v164_v29, %v163_v28  ;;  %v148_v32 = vld [vmem:[#allocation2 + $0x48] sm:$0xff]  ;;  %v166_v35 = vld [vmem:[#allocation2 + $0xd8] sm:$0xff]  ;;  %v149_v37 = vld [vmem:[#allocation2 + $0x50] sm:$0xff] }
  0x1c   :  { %v596_v33 = vpack.c.bf16 %v148_v32, %v147_v31  ;;  %v598_v36 = vpack.c.bf16 %v166_v35, %v165_v34  ;;  %v150_v38 = vld [vmem:[#allocation2 + $0x58] sm:$0xff]  ;;  %v167_v40 = vld [vmem:[#allocation2 + $0xe0] sm:$0xff]  ;;  %v168_v41 = vld [vmem:[#allocation2 + $0xe8] sm:$0xff] }
  0x1d   :  { %585 = vmatpush3.bf16.msra.mxu1 %v584_v17  ;;  %v600_v39 = vpack.c.bf16 %v150_v38, %v149_v37  ;;  %v151_v42 = vld [vmem:[#allocation2 + $0x60] sm:$0xff]  ;;  %v602_v43 = vpack.c.bf16 %v168_v41, %v167_v40  ;;  %v152_v44 = vld [vmem:[#allocation2 + $0x68] sm:$0xff]  ;;  %v169_v45 = vld [vmem:[#allocation2 + $0xf0] sm:$0xff] }
  0x1e   :  { %587 = vmatprep.subr.bf16.mxu1 %v586_v18  ;;  %v170_v46 = vld [vmem:[#allocation2 + $0xf8] sm:$0xff]  ;;  %v604_v47 = vpack.c.bf16 %v152_v44, %v151_v42  ;;  %v153_v49 = vld [vmem:[#allocation2 + $0x70] sm:$0xff]  ;;  %v249_v52 = vld [vmem:[%s907_s5] sm:$0xff] }
  0x1f   :  { %v606_v48 = vpack.c.bf16 %v170_v46, %v169_v45  ;;  %v154_v50 = vld [vmem:[#allocation2 + $0x78] sm:$0xff]  ;;  %v250_v53 = vld [vmem:[%s907_s5 + $0x8] sm:$0xff]  ;;  %v251_v54 = vld [vmem:[%s907_s5 + $0x10] sm:$0xff] }
  0x20   :  { %v608_v51 = vpack.c.bf16 %v154_v50, %v153_v49  ;;  %v611_v56 = vpack.c.bf16 %v250_v53, %v249_v52  ;;  %v252_v57 = vld [vmem:[%s907_s5 + $0x18] sm:$0xff]  ;;  %v253_v59 = vld [vmem:[%s907_s5 + $0x20] sm:$0xff]  ;;  %v254_v60 = vld [vmem:[%s907_s5 + $0x28] sm:$0xff] }
  0x21   :  { %589 = vmatpush3.bf16.msra.mxu1 %v588_v23  ;;  %v614_v58 = vpack.c.bf16 %v252_v57, %v251_v54  ;;  %v617_v61 = vpack.c.bf16 %v254_v60, %v253_v59  ;;  %v255_v62 = vld [vmem:[%s907_s5 + $0x30] sm:$0xff]  ;;  %v256_v63 = vld [vmem:[%s907_s5 + $0x38] sm:$0xff]  ;;  %v50_v5 = vld [vmem:[%s904_s2] sm:$0x3] }
  0x22   :  { %591 = vmatprep.subr.bf16.mxu1 %v590_v24  ;;  %612 = vmatpush3.bf16.msra.mxu0 %v611_v56  ;;  %v620_v1 = vpack.c.bf16 %v256_v63, %v255_v62  ;;  %v55_v7 = vrot.slane %v50_v5, %v54_v4  ;;  %v59_v8 = vrot.slane %v50_v5, %v58_v6  ;;  %v257_v15 = vld [vmem:[%s907_s5 + $0x40] sm:$0xff]  ;;  %v258_v16 = vld [vmem:[%s907_s5 + $0x48] sm:$0xff]  ;;  %v259_v18 = vld [vmem:[%s907_s5 + $0x50] sm:$0xff] }
  0x23   :  { %613 = vmatprep.subr.bf16.mxu0 %v717_v55  ;;  %v623_v17 = vpack.c.bf16 %v258_v16, %v257_v15  ;;  %v260_v19 = vld [vmem:[%s907_s5 + $0x58] sm:$0xff]  ;;  %v261_v21 = vld [vmem:[%s907_s5 + $0x60] sm:$0xff]  ;;  %v262_v22 = vld [vmem:[%s907_s5 + $0x68] sm:$0xff] }
  0x24   :  { %v626_v20 = vpack.c.bf16 %v260_v19, %v259_v18  ;;  %v629_v23 = vpack.c.bf16 %v262_v22, %v261_v21  ;;  %v263_v24 = vld [vmem:[%s907_s5 + $0x70] sm:$0xff]  ;;  %v264_v25 = vld [vmem:[%s907_s5 + $0x78] sm:$0xff]  ;;  %v344_v28 = vld [vmem:[%s909_s7 + $0x8] sm:$0xff] }
  0x25   :  { %593 = vmatpush3.bf16.msra.mxu1 %v592_v27  ;;  %v632_v26 = vpack.c.bf16 %v264_v25, %v263_v24  ;;  %v343_v27 = vld [vmem:[%s909_s7] sm:$0xff]  ;;  %v345_v35 = vld [vmem:[%s909_s7 + $0x10] sm:$0xff]  ;;  %v350_v42 = vld [vmem:[%s909_s7 + $0x38] sm:$0xff] }
  0x26   :  { %595 = vmatprep.subr.bf16.mxu1 %v594_v30  ;;  %615 = vmatpush3.bf16.msra.mxu0 %v614_v58  ;;  %v635_v29 = vpack.c.bf16 %v344_v28, %v343_v27  ;;  %v347_v38 = vld [vmem:[%s909_s7 + $0x20] sm:$0xff]  ;;  %v349_v41 = vld [vmem:[%s909_s7 + $0x30] sm:$0xff] }
  0x27   :  { %616 = vmatprep.subr.bf16.mxu0 %v717_v55  ;;  %v460_v44 = vld [vmem:[%s908_s6] ss:$0 sm:$0xff]  ;;  %s719_s6 = smov [#allocation5]  }
  0x28   :  { %v461_v49 = vld [vmem:[%s910_s8] ss:$0 sm:$0xff] }
  0x29   :  { %597 = vmatpush3.bf16.msra.mxu1 %v596_v33 }
  0x2a   :  { %599 = vmatprep.subr.bf16.mxu1 %v598_v36  ;;  %618 = vmatpush3.bf16.msra.mxu0 %v617_v61  ;;  %v346_v36 = vld [vmem:[%s909_s7 + $0x18] sm:$0xff] }
  0x2b   :  { %619 = vmatprep.subr.bf16.mxu0 %v717_v55  ;;  %v638_v37 = vpack.c.bf16 %v346_v36, %v345_v35 }
  0x2d   :  { %601 = vmatpush3.bf16.msra.mxu1 %v600_v39  ;;  %v348_v39 = vld [vmem:[%s909_s7 + $0x28] sm:$0xff]  ;;  %s449_s7 = sshll.u32 %s719_s6, 4  ;;  %s450_s7 = int_to_ptr.vmem [resolvable:$true] %s449_s7 }
  0x2e   :  { %603 = vmatprep.subr.bf16.mxu1 %v602_v43  ;;  %621 = vmatpush3.bf16.msra.mxu0 %v620_v1  ;;  %v641_v40 = vpack.c.bf16 %v348_v39, %v347_v38  ;;  %v644_v43 = vpack.c.bf16 %v350_v42, %v349_v41  ;;  %s687_s8 = scalar_lea.vmem %s450_s7, 128  ;;  %p692_p9 = scmp.lt.s32.totalorder %s450_s7, %s450_s7 }
  0x2f   :  { %622 = vmatprep.subr.bf16.mxu0 %v717_v55  ;;  %p688_p8 = scmp.ne.s32.totalorder %s450_s7, %s687_s8  ;;  %p693_p10 = scmp.lt.s32.totalorder %s687_s8, %s687_s8 }
  0x31   :  { %605 = vmatpush3.bf16.msra.mxu1 %v604_v47  ;;  %p694_p11 = por %p693_p10, %p692_p9 }
  0x32   :  { %607 = vmatprep.subr.bf16.mxu1 %v606_v48  ;;  %624 = vmatpush3.bf16.msra.mxu0 %v623_v17 }
  0x33   :  { %625 = vmatprep.subr.bf16.mxu0 %v717_v55  ;;  %p695_p12 = pnand %p694_p11, %p688_p8 }
  0x35   :  { %609 = vmatpush3.bf16.msra.mxu1 %v608_v51 }
  0x36   :  { %634 = vmatprep.subr.bf16.mxu1 %v717_v55  ;;  %627 = vmatpush3.bf16.msra.mxu0 %v626_v20 }
  0x37   :  { %628 = vmatprep.subr.bf16.mxu0 %v717_v55 }
  0x3a   :  { %630 = vmatpush3.bf16.msra.mxu0 %v629_v23 }
  0x3b   :  { %631 = vmatprep.subr.bf16.mxu0 %v717_v55 }
  0x3e   :  { %633 = vmatpush3.bf16.msra.mxu0 %v632_v26 }
  0xe9   :  { %v132_v9 = vpop.f32.mrb[0].mxu0 }
  0xea   :  { %v133_v10 = vadd.f32 %v132_v9, %v55_v7  ;;  %v134_v11 = vpop.f32.mrb[1].mxu0 }
  0xeb   :  { %v135_v12 = vadd.f32 %v134_v11, %v59_v8 }
  0xed   :  { %653 = vtanh.f32 %v135_v12 }
  0xee   :  { %655 = vtanh.f32 %v133_v10 }
  0xf7   :  { %v654_v13 = vpop.eup %653 }
  0xf8   :  { %v656_v14 = vpop.eup %655  ;;  %242 = vmatprep.mubr.f32.mxu1 %v654_v13 }
  0xf9   :  { %243 = vmatmul.mubr.f32.vlgmr.msra.gmra.mrb[0].mxu1 %v656_v14 }
  0xfa   :  { %575 = vmatprep.mubr.msk.f32.mxu1 %vm718_vm1, %v716_v0  ;;  %636 = vmatpush3.bf16.msra.mxu1 %v635_v29  ;;  %v459_v0 = vld [vmem:[%s906_s4] ss:$0 sm:$0xff] }
  0xfb   :  { %637 = vmatprep.subr.bf16.mxu1 %v717_v55 }
  0xfe   :  { %639 = vmatpush3.bf16.msra.mxu1 %v638_v37 }
  0xff   :  { %640 = vmatprep.subr.bf16.mxu1 %v717_v55 }
 0x102   :  { %642 = vmatpush3.bf16.msra.mxu1 %v641_v40 }
 0x103   :  { %643 = vmatprep.subr.bf16.mxu1 %v717_v55 }
 0x106   :  { %645 = vmatpush3.bf16.msra.mxu1 %v644_v43 }
 0x1cc   :  { %v495_v30 = vpop.f32.mrb[0].mxu1 }
 0x1cd   :  { %v496_v31 = vpop.f32.mrb[1].mxu1 }
 0x1ce   :  { %v497_v32 = vadd.f32 %v496_v31, %v495_v30 }
 0x1d0   :  { %v245_v33 = vadd.f32 %v497_v32, %v459_v0 }
 0x1d2   :  { %657 = vtanh.f32 %v245_v33 }
 0x1dc   :  { %v658_v34 = vpop.eup %657 }
 0x1dd   :  { %557 = vmatmul.mubr.f32.vlgmr.msra.gmra.mrb[2].mxu0 %v658_v34 }
 0x2b0   :  { %v338_v45 = vpop.f32.mrb[2].mxu0 }
 0x2b1   :  { %v339_v46 = vadd.f32 %v460_v44, %v338_v45  ;;  %v558_v47 = vpop.f32.mrb[3].mxu0 }
 0x2b3   :  { %659 = vtanh.f32 %v339_v46 }
 0x2bd   :  { %v660_v48 = vpop.eup %659 }
 0x2be   :  { %576 = vmatmul.mubr.msk.f32.vlgmr.msra.gmra.mrb[2].mxu1 %vm358_vm2, %v660_v48 }
 0x391   :  { %v428_v50 = vpop.f32.mrb[2].mxu1 }
 0x392   :  { %v429_v51 = vadd.f32 %v461_v49, %v428_v50  ;;  %v577_v52 = vpop.f32.mrb[3].mxu1 }
 0x394   :  { %432 = vmax.xlane.f32.xlu0 %v429_v51 }
 0x421   :  { %v433_v53 = vpop.xlane.xlu0 %432 }
 0x422   :  { %v434_v54 = vsub.f32 %v429_v51, %v433_v53 }
 0x424   :  { %v435_v55 = vmul.f32 1.442695, %v434_v54 }
 0x426   :  { %661 = vpow2.f32 %v435_v55 }
 0x430   :  { %v662_v56 = vpop.eup %661 }
 0x431   :  { %437 = vadd.xlane.f32.xlu0 %v662_v56 }
 0x4be   :  { %v438_v57 = vpop.xlane.xlu0 %437 }
 0x4bf   :  { %663 = vlog2.f32 %v438_v57 }
 0x4c9   :  { %v664_v58 = vpop.eup %663 }
 0x4ca   :  { %v440_v59 = vmul.f32 0.6931472, %v664_v58 }
 0x4cc   :  { %v441_v60 = vsub.f32 %v434_v54, %v440_v59 }
 0x4ce   :  { %442 = vst [vmem:[#allocation5] sm:$0xff] %v441_v60 }
 0x4cf   :  { %698 = shalt.err (!%p695_p12)
}
 0x4d0   :  { %s699_s11 = scalar_lea.hbm %s911_s9, 128 }
 0x4d1   :  { %p700_p13 = scmp.ne.s32.totalorder %s911_s9, %s699_s11  ;;  %p703_p0 = scmp.lt.u32.totalorder %s699_s11, %s911_s9 }
 0x4d3   :  { %p705_p1 = pnand %p703_p0, %p700_p13 }
 0x4d5   :  { %708 = shalt.err (!%p705_p1)
}
 0x4d6   :  { %452 = dma.vmem_to_hbm [thread:$0]  %s450_s7, 128, %s911_s9, [#allocation4]  }
 0x4d7   :  { %711 = dma.done.wait [#allocation4], 128  }
 0x4d8   :  { %712 = vsyncadd [#allocation4], 4294967168 }
 0x4d9   :  { %456 = vsyncpa [#allocation3], 1 }
 0x4da   :  { %457 = vsyncpa [#allocation4], 1 }

</bundles_post_ra>
